<compile_context>
chip_gen: v6e
topology: v6e:2x2x1
jax: 0.10.0
libtpu: 0.0.40
codegen_flags: <defaults>
</compile_context>

<pallas_src>
import jax
import jax.numpy as jnp
from jax.experimental import pallas as pl
from jax.experimental.pallas import tpu as pltpu

NEURONS_PER_LAYER_DISCRIMINATOR = 256
MAX_TILE_B = 1024  # batch tile cap: multiple of 8; keeps >=2 tiles for big batches


def _round_up(x, m):
    return ((x + m - 1) // m) * m


def _leaky_relu(x, slope=0.2):
    # For 0 < slope < 1, LeakyReLU == max(x, slope*x): mul + max on the VPU.
    return jnp.maximum(x, slope * x)


def discriminator_kernel(
    xc_ref, xo_ref,        # [TILE_B, IN_HALF] f32 (bf16 cast done in-kernel)
    w1a_ref, w1b_ref,      # [IN_HALF, H] bf16 (BN1 scale folded into columns)
    b1_ref,                # [1, H] f32 (BN1 shift)
    w2_ref, b2_ref,        # [H, H] bf16, [1, H] f32
    w3_ref, b3_ref,        # [H, H] bf16, [1, H] f32
    w4_ref,                # [1, H] f32 head weight as a row (VPU)
    o_ref,                 # [TILE_B, 1] f32 probabilities
):
    # Layer 1: concat(xc, xo) @ W1 realized as two small-K MXU passes.
    h = jnp.dot(xc_ref[...].astype(jnp.bfloat16), w1a_ref[...],
                preferred_element_type=jnp.float32)
    h += jnp.dot(xo_ref[...].astype(jnp.bfloat16), w1b_ref[...],
                 preferred_element_type=jnp.float32)
    h = _leaky_relu(h + b1_ref[...])          # f32 epilogue (safe on v5e too)

    # Layer 2
    h = jnp.dot(h.astype(jnp.bfloat16), w2_ref[...],
                preferred_element_type=jnp.float32)
    h = _leaky_relu(h + b2_ref[...])

    # Layer 3
    h = jnp.dot(h.astype(jnp.bfloat16), w3_ref[...],
                preferred_element_type=jnp.float32)
    h = _leaky_relu(h + b3_ref[...])

    # Output head: [TILE_B,256] . [256] via VPU multiply + lane reduce.
    # keepdims keeps rows on sublanes -> direct (TILE_B, 1) store, no transpose.
    logits = jnp.sum(h * w4_ref[...], axis=-1, keepdims=True)
    o_ref[...] = jax.nn.sigmoid(logits)


@jax.jit
def discriminator_forward(x_cropped, x_original, params):
    H = NEURONS_PER_LAYER_DISCRIMINATOR
    B, in_half = x_cropped.shape

    # Tiny pad only to the next multiple of 8 rows (sublane granularity), and
    # only when needed.  No full-tile jnp.pad copy; ragged tiles are masked.
    b_pad = _round_up(B, 8)
    if b_pad != B:
        x_cropped = jnp.pad(x_cropped, ((0, b_pad - B), (0, 0)))
        x_original = jnp.pad(x_original, ((0, b_pad - B), (0, 0)))

    tile_b = min(MAX_TILE_B, b_pad)
    num_tiles = pl.cdiv(b_pad, tile_b)   # partial last tile handled by Pallas

    def resident(shape):
        # Same block index every grid step -> stays in VMEM, no per-step re-DMA.
        return pl.BlockSpec(shape, lambda i: (0,) * len(shape))

    def batch_spec(cols):
        return pl.BlockSpec((tile_b, cols), lambda i: (i, 0))

    flops = b_pad * 2 * (2 * in_half * H + 2 * H * H + H)
    bytes_accessed = (2 * b_pad * in_half * 4           # xc, xo (f32)
                      + 2 * in_half * H * 2 + 2 * H * H * 2  # weights (bf16)
                      + 4 * H * 4                       # shifts + head row (f32)
                      + b_pad * 4)                      # output (f32)

    out = pl.pallas_call(
        discriminator_kernel,
        out_shape=jax.ShapeDtypeStruct((b_pad, 1), jnp.float32),
        grid_spec=pltpu.PrefetchScalarGridSpec(
            num_scalar_prefetch=0,
            grid=(num_tiles,),
            in_specs=[
                batch_spec(in_half),      # x_cropped tile
                batch_spec(in_half),      # x_original tile
                resident((in_half, H)),   # w1a (bf16, BN1 folded)
                resident((in_half, H)),   # w1b (bf16, BN1 folded)
                resident((1, H)),         # b1 shift
                resident((H, H)),         # w2
                resident((1, H)),         # b2 shift
                resident((H, H)),         # w3
                resident((1, H)),         # b3 shift
                resident((1, H)),         # w4 head row (f32)
            ],
            out_specs=pl.BlockSpec((tile_b, 1), lambda i: (i, 0)),
        ),
        compiler_params=pltpu.CompilerParams(
            dimension_semantics=("parallel",)),
        cost_estimate=pl.CostEstimate(
            flops=int(flops),
            transcendentals=int(2 * b_pad),          # sigmoid ~ exp + recip
            bytes_accessed=int(bytes_accessed)),
    )(x_cropped, x_original,
      params["w1a"], params["w1b"], params["b1"],
      params["w2"], params["b2"],
      params["w3"], params["b3"],
      params["w4"])

    return out[:B]   # drop any padded / masked rows


def make_params(key, num_joints):
    """Deterministic parameter init mirroring the PyTorch module shapes,
    with eval-mode BatchNorm folded into the preceding Linear weights and
    W1 split into the cropped / original halves."""
    H = NEURONS_PER_LAYER_DISCRIMINATOR
    image_size = num_joints * 2
    in_dim = image_size * 2          # concat of the two keypoint tensors
    in_half = image_size
    eps = 0.8                        # nn.BatchNorm1d(H, 0.8) -> eps=0.8

    ks = jax.random.split(key, 10)

    def linear_w(k, fan_in, fan_out):
        # PyTorch Linear default: U(-1/sqrt(fan_in), 1/sqrt(fan_in)); stored [in, out].
        bound = 1.0 / jnp.sqrt(fan_in)
        return jax.random.uniform(k, (fan_in, fan_out), jnp.float32, -bound, bound)

    def bn_fold(kg, kb):
        gamma = 1.0 + 0.1 * jax.random.normal(kg, (H,), jnp.float32)
        beta = 0.1 * jax.random.normal(kb, (H,), jnp.float32)
        running_mean = jnp.zeros((H,), jnp.float32)
        running_var = jnp.ones((H,), jnp.float32)
        scale = gamma / jnp.sqrt(running_var + eps)
        shift = beta - running_mean * scale
        return scale, shift

    w1 = linear_w(ks[0], in_dim, H)
    s1, b1 = bn_fold(ks[1], ks[2])
    w2 = linear_w(ks[3], H, H)
    s2, b2 = bn_fold(ks[4], ks[5])
    w3 = linear_w(ks[6], H, H)
    s3, b3 = bn_fold(ks[7], ks[8])
    w4 = linear_w(ks[9], H, 1)

    w1_folded = w1 * s1[None, :]
    return {
        # BN scale folded into the preceding Linear weight (per output column);
        # matmul weights in bf16 for the MXU, shifts / head row in f32 (VPU).
        "w1a": w1_folded[:in_half].astype(jnp.bfloat16),
        "w1b": w1_folded[in_half:].astype(jnp.bfloat16),
        "b1": b1.reshape(1, H),
        "w2": (w2 * s2[None, :]).astype(jnp.bfloat16),
        "b2": b2.reshape(1, H),
        "w3": (w3 * s3[None, :]).astype(jnp.bfloat16),
        "b3": b3.reshape(1, H),
        "w4": w4.reshape(1, H),
    }


if __name__ == "__main__":
    num_joints = 8          # -> image_size = 16, per-input dim = 16
    batch = 8

    key = jax.random.PRNGKey(0)
    k_p, k_x1, k_x2 = jax.random.split(key, 3)

    params = make_params(k_p, num_joints)
    x_cropped = jax.random.normal(k_x1, (batch, num_joints * 2), jnp.float32)
    x_original = jax.random.normal(k_x2, (batch, num_joints * 2), jnp.float32)

    out = discriminator_forward(x_cropped, x_original, params)
    out = jax.block_until_ready(out)

    # Pure-JAX reference with identical bf16-matmul / f32-accumulate math.
    xc16 = x_cropped.astype(jnp.bfloat16)
    xo16 = x_original.astype(jnp.bfloat16)
    h = (jnp.dot(xc16, params["w1a"], preferred_element_type=jnp.float32)
         + jnp.dot(xo16, params["w1b"], preferred_element_type=jnp.float32)
         + params["b1"])
    h = jnp.maximum(h, 0.2 * h)
    h = jnp.dot(h.astype(jnp.bfloat16), params["w2"],
                preferred_element_type=jnp.float32) + params["b2"]
    h = jnp.maximum(h, 0.2 * h)
    h = jnp.dot(h.astype(jnp.bfloat16), params["w3"],
                preferred_element_type=jnp.float32) + params["b3"]
    h = jnp.maximum(h, 0.2 * h)
    ref = jax.nn.sigmoid(jnp.sum(h * params["w4"], axis=-1, keepdims=True))

    assert out.shape == (batch, 1), out.shape
    assert jnp.allclose(out, ref, atol=1e-3, rtol=1e-3), (out, ref)
    print("KERNEL_OK")
</pallas_src>

<mosaic_0001>
module attributes {stable_mosaic.version = 11 : i64} {
  func.func @discriminator_kernel(%arg0: i32, %arg1: memref<8x16xf32, #tpu.memory_space<vmem>>, %arg2: memref<8x16xf32, #tpu.memory_space<vmem>>, %arg3: memref<16x256xbf16, #tpu.memory_space<vmem>>, %arg4: memref<16x256xbf16, #tpu.memory_space<vmem>>, %arg5: memref<1x256xf32, #tpu.memory_space<vmem>>, %arg6: memref<256x256xbf16, #tpu.memory_space<vmem>>, %arg7: memref<1x256xf32, #tpu.memory_space<vmem>>, %arg8: memref<256x256xbf16, #tpu.memory_space<vmem>>, %arg9: memref<1x256xf32, #tpu.memory_space<vmem>>, %arg10: memref<1x256xf32, #tpu.memory_space<vmem>>, %arg11: memref<8x1xf32, #tpu.memory_space<vmem>>) attributes {dimension_semantics = [#tpu.dimension_semantics<parallel>], iteration_bounds = array<i64: 1>, scalar_prefetch = 0 : i64, scratch_operands = 0 : i64, tpu.core_type = #tpu.core_type<tc>, window_params = [{transform_indices = @transform_0, window_bounds = array<i64: 8, 16>}, {transform_indices = @transform_1, window_bounds = array<i64: 8, 16>}, {pipeline_mode = #tpu.pipeline_mode<synchronous>, transform_indices = @transform_2, window_bounds = array<i64: 16, 256>}, {pipeline_mode = #tpu.pipeline_mode<synchronous>, transform_indices = @transform_3, window_bounds = array<i64: 16, 256>}, {pipeline_mode = #tpu.pipeline_mode<synchronous>, transform_indices = @transform_4, window_bounds = array<i64: 1, 256>}, {pipeline_mode = #tpu.pipeline_mode<synchronous>, transform_indices = @transform_5, window_bounds = array<i64: 256, 256>}, {pipeline_mode = #tpu.pipeline_mode<synchronous>, transform_indices = @transform_6, window_bounds = array<i64: 1, 256>}, {pipeline_mode = #tpu.pipeline_mode<synchronous>, transform_indices = @transform_7, window_bounds = array<i64: 256, 256>}, {pipeline_mode = #tpu.pipeline_mode<synchronous>, transform_indices = @transform_8, window_bounds = array<i64: 1, 256>}, {pipeline_mode = #tpu.pipeline_mode<synchronous>, transform_indices = @transform_9, window_bounds = array<i64: 1, 256>}, {transform_indices = @transform_10, window_bounds = array<i64: 8, 1>}]} {
    %c0 = arith.constant 0 : index
    %c0_0 = arith.constant 0 : index
    %0 = vector.load %arg1[%c0, %c0_0] : memref<8x16xf32, #tpu.memory_space<vmem>>, vector<8x16xf32>
    %1 = arith.truncf %0 : vector<8x16xf32> to vector<8x16xbf16>
    %c0_1 = arith.constant 0 : index
    %c0_2 = arith.constant 0 : index
    %2 = vector.load %arg3[%c0_1, %c0_2] : memref<16x256xbf16, #tpu.memory_space<vmem>>, vector<16x256xbf16>
    %cst = arith.constant dense<0.000000e+00> : vector<8x256xf32>
    %3 = tpu.matmul %1, %2, %cst {dimension_numbers = #tpu.dot_dimension_numbers<[1], [0], [0], [1], [0, 0, 1, 1], [], []>} : vector<8x16xbf16>, vector<16x256xbf16>, vector<8x256xf32> -> vector<8x256xf32>
    %c0_3 = arith.constant 0 : index
    %c0_4 = arith.constant 0 : index
    %4 = vector.load %arg2[%c0_3, %c0_4] : memref<8x16xf32, #tpu.memory_space<vmem>>, vector<8x16xf32>
    %5 = arith.truncf %4 : vector<8x16xf32> to vector<8x16xbf16>
    %c0_5 = arith.constant 0 : index
    %c0_6 = arith.constant 0 : index
    %6 = vector.load %arg4[%c0_5, %c0_6] : memref<16x256xbf16, #tpu.memory_space<vmem>>, vector<16x256xbf16>
    %cst_7 = arith.constant dense<0.000000e+00> : vector<8x256xf32>
    %7 = tpu.matmul %5, %6, %cst_7 {dimension_numbers = #tpu.dot_dimension_numbers<[1], [0], [0], [1], [0, 0, 1, 1], [], []>} : vector<8x16xbf16>, vector<16x256xbf16>, vector<8x256xf32> -> vector<8x256xf32>
    %8 = arith.addf %3, %7 : vector<8x256xf32>
    %c0_8 = arith.constant 0 : index
    %c0_9 = arith.constant 0 : index
    %9 = vector.load %arg5[%c0_8, %c0_9] : memref<1x256xf32, #tpu.memory_space<vmem>>, vector<1x256xf32>
    %10 = vector.broadcast %9 : vector<1x256xf32> to vector<8x256xf32>
    %11 = arith.addf %8, %10 : vector<8x256xf32>
    %cst_10 = arith.constant 2.000000e-01 : f32
    %12 = vector.broadcast %cst_10 : f32 to vector<8x256xf32>
    %13 = arith.mulf %12, %11 : vector<8x256xf32>
    %14 = arith.maximumf %11, %13 : vector<8x256xf32>
    %15 = arith.truncf %14 : vector<8x256xf32> to vector<8x256xbf16>
    %c0_11 = arith.constant 0 : index
    %c0_12 = arith.constant 0 : index
    %16 = vector.load %arg6[%c0_11, %c0_12] : memref<256x256xbf16, #tpu.memory_space<vmem>>, vector<256x256xbf16>
    %cst_13 = arith.constant dense<0.000000e+00> : vector<8x256xf32>
    %17 = tpu.matmul %15, %16, %cst_13 {dimension_numbers = #tpu.dot_dimension_numbers<[1], [0], [0], [1], [0, 0, 1, 1], [], []>} : vector<8x256xbf16>, vector<256x256xbf16>, vector<8x256xf32> -> vector<8x256xf32>
    %c0_14 = arith.constant 0 : index
    %c0_15 = arith.constant 0 : index
    %18 = vector.load %arg7[%c0_14, %c0_15] : memref<1x256xf32, #tpu.memory_space<vmem>>, vector<1x256xf32>
    %19 = vector.broadcast %18 : vector<1x256xf32> to vector<8x256xf32>
    %20 = arith.addf %17, %19 : vector<8x256xf32>
    %cst_16 = arith.constant 2.000000e-01 : f32
    %21 = vector.broadcast %cst_16 : f32 to vector<8x256xf32>
    %22 = arith.mulf %21, %20 : vector<8x256xf32>
    %23 = arith.maximumf %20, %22 : vector<8x256xf32>
    %24 = arith.truncf %23 : vector<8x256xf32> to vector<8x256xbf16>
    %c0_17 = arith.constant 0 : index
    %c0_18 = arith.constant 0 : index
    %25 = vector.load %arg8[%c0_17, %c0_18] : memref<256x256xbf16, #tpu.memory_space<vmem>>, vector<256x256xbf16>
    %cst_19 = arith.constant dense<0.000000e+00> : vector<8x256xf32>
    %26 = tpu.matmul %24, %25, %cst_19 {dimension_numbers = #tpu.dot_dimension_numbers<[1], [0], [0], [1], [0, 0, 1, 1], [], []>} : vector<8x256xbf16>, vector<256x256xbf16>, vector<8x256xf32> -> vector<8x256xf32>
    %c0_20 = arith.constant 0 : index
    %c0_21 = arith.constant 0 : index
    %27 = vector.load %arg9[%c0_20, %c0_21] : memref<1x256xf32, #tpu.memory_space<vmem>>, vector<1x256xf32>
    %28 = vector.broadcast %27 : vector<1x256xf32> to vector<8x256xf32>
    %29 = arith.addf %26, %28 : vector<8x256xf32>
    %cst_22 = arith.constant 2.000000e-01 : f32
    %30 = vector.broadcast %cst_22 : f32 to vector<8x256xf32>
    %31 = arith.mulf %30, %29 : vector<8x256xf32>
    %32 = arith.maximumf %29, %31 : vector<8x256xf32>
    %c0_23 = arith.constant 0 : index
    %c0_24 = arith.constant 0 : index
    %33 = vector.load %arg10[%c0_23, %c0_24] : memref<1x256xf32, #tpu.memory_space<vmem>>, vector<1x256xf32>
    %34 = vector.broadcast %33 : vector<1x256xf32> to vector<8x256xf32>
    %35 = arith.mulf %32, %34 : vector<8x256xf32>
    %cst_25 = arith.constant dense<0.000000e+00> : vector<8xf32>
    %36 = vector.multi_reduction <add>, %35, %cst_25 [1] : vector<8x256xf32> to vector<8xf32>
    %37 = vector.shape_cast %36 : vector<8xf32> to vector<8x1xf32>
    %38 = arith.negf %37 : vector<8x1xf32>
    %39 = math.exp %38 : vector<8x1xf32>
    %cst_26 = arith.constant 1.000000e+00 : f32
    %40 = vector.broadcast %cst_26 : f32 to vector<8x1xf32>
    %41 = arith.addf %40, %39 : vector<8x1xf32>
    %42 = arith.divf %40, %41 : vector<8x1xf32>
    %c0_27 = arith.constant 0 : index
    %c0_28 = arith.constant 0 : index
    %43 = vector.load %arg11[%c0_27, %c0_28] : memref<8x1xf32, #tpu.memory_space<vmem>>, vector<8x1xf32>
    tpu.vector_store %arg11[%c0_27, %c0_28], %42 {strides = array<i32>} : memref<8x1xf32, #tpu.memory_space<vmem>>, vector<8x1xf32>,
    return
  }
  func.func @transform_0(%arg0: i32) -> (i32, i32) {
    %c0_i32 = arith.constant 0 : i32
    %c0_i32_0 = arith.constant 0 : i32
    return %arg0, %c0_i32 : i32, i32
  }
  func.func @transform_1(%arg0: i32) -> (i32, i32) {
    %c0_i32 = arith.constant 0 : i32
    %c0_i32_0 = arith.constant 0 : i32
    return %arg0, %c0_i32 : i32, i32
  }
  func.func @transform_2(%arg0: i32) -> (i32, i32) {
    %c0_i32 = arith.constant 0 : i32
    %c0_i32_0 = arith.constant 0 : i32
    %c0_i32_1 = arith.constant 0 : i32
    return %c0_i32, %c0_i32_0 : i32, i32
  }
  func.func @transform_3(%arg0: i32) -> (i32, i32) {
    %c0_i32 = arith.constant 0 : i32
    %c0_i32_0 = arith.constant 0 : i32
    %c0_i32_1 = arith.constant 0 : i32
    return %c0_i32, %c0_i32_0 : i32, i32
  }
  func.func @transform_4(%arg0: i32) -> (i32, i32) {
    %c0_i32 = arith.constant 0 : i32
    %c0_i32_0 = arith.constant 0 : i32
    %c0_i32_1 = arith.constant 0 : i32
    return %c0_i32, %c0_i32_0 : i32, i32
  }
  func.func @transform_5(%arg0: i32) -> (i32, i32) {
    %c0_i32 = arith.constant 0 : i32
    %c0_i32_0 = arith.constant 0 : i32
    %c0_i32_1 = arith.constant 0 : i32
    return %c0_i32, %c0_i32_0 : i32, i32
  }
  func.func @transform_6(%arg0: i32) -> (i32, i32) {
    %c0_i32 = arith.constant 0 : i32
    %c0_i32_0 = arith.constant 0 : i32
    %c0_i32_1 = arith.constant 0 : i32
    return %c0_i32, %c0_i32_0 : i32, i32
  }
  func.func @transform_7(%arg0: i32) -> (i32, i32) {
    %c0_i32 = arith.constant 0 : i32
    %c0_i32_0 = arith.constant 0 : i32
    %c0_i32_1 = arith.constant 0 : i32
    return %c0_i32, %c0_i32_0 : i32, i32
  }
  func.func @transform_8(%arg0: i32) -> (i32, i32) {
    %c0_i32 = arith.constant 0 : i32
    %c0_i32_0 = arith.constant 0 : i32
    %c0_i32_1 = arith.constant 0 : i32
    return %c0_i32, %c0_i32_0 : i32, i32
  }
  func.func @transform_9(%arg0: i32) -> (i32, i32) {
    %c0_i32 = arith.constant 0 : i32
    %c0_i32_0 = arith.constant 0 : i32
    %c0_i32_1 = arith.constant 0 : i32
    return %c0_i32, %c0_i32_0 : i32, i32
  }
  func.func @transform_10(%arg0: i32) -> (i32, i32) {
    %c0_i32 = arith.constant 0 : i32
    %c0_i32_0 = arith.constant 0 : i32
    return %arg0, %c0_i32 : i32, i32
  }
}

</mosaic_0001>

<bundles_post_ra>
// kernel: discriminator_forward.1
= control target key start
LH: loop header
LB: loop body
LE: loop exit
PB: predicated region body
PF: predicated region fallthrough
CT: control target
= control target key end

     0   :  { %15 = vsyncpa [#allocation3], 0  ;;  %s1219_s0 = inlined_call_operand.hbm [shape: f32[8,16], index: 0, kind: input, shape index: {}]   ;;  %s1220_s1 = inlined_call_operand.hbm [shape: f32[8,16], index: 1, kind: input, shape index: {}]   ;;  %s1221_s2 = inlined_call_operand.hbm [shape: bf16[16,256], index: 2, kind: input, shape index: {}]   ;;  %s1222_s3 = inlined_call_operand.hbm [shape: bf16[16,256], index: 3, kind: input, shape index: {}]   ;;  %s1223_s4 = inlined_call_operand.vmem [shape: f32[1,256], index: 4, kind: input, shape index: {}]   ;;  %s1224_s5 = inlined_call_operand.hbm [shape: bf16[256,256], index: 5, kind: input, shape index: {}]   ;;  %s1225_s6 = inlined_call_operand.vmem [shape: f32[1,256], index: 6, kind: input, shape index: {}]   ;;  %s1226_s7 = inlined_call_operand.hbm [shape: bf16[256,256], index: 7, kind: input, shape index: {}]   ;;  %s1227_s8 = inlined_call_operand.vmem [shape: f32[1,256], index: 8, kind: input, shape index: {}]   ;;  %s1228_s9 = inlined_call_operand.vmem [shape: f32[1,256], index: 9, kind: input, shape index: {}]   ;;  %s1229_s10 = inlined_call_operand.vmem [shape: f32[8,1], index: 10, kind: output, shape index: {}]  }
   0x1   :  { %16 = vsyncpa [#allocation5], 0 }
   0x2   :  { %17 = vsyncpa [#allocation8], 0 }
   0x3   :  { %18 = vsyncpa [#allocation11], 0  ;;  %s1098_s13 = smov [#allocation4]  }
   0x4   :  { %s35_s14 = sshll.u32 %s1098_s13, 4  ;;  %s36_s14 = int_to_ptr.vmem [resolvable:$true] %s35_s14 }
   0x5   :  { %s978_s15 = scalar_lea.vmem %s36_s14, 128  ;;  %p983_p1 = scmp.lt.s32.totalorder %s36_s14, %s36_s14 }
   0x6   :  { %p979_p0 = scmp.ne.s32.totalorder %s36_s14, %s978_s15  ;;  %p984_p2 = scmp.lt.s32.totalorder %s978_s15, %s978_s15 }
   0x8   :  { %p985_p3 = por %p984_p2, %p983_p1 }
   0xa   :  { %p986_p4 = pnand %p985_p3, %p979_p0 }
   0xc   :  { %989 = shalt.err (!%p986_p4)
}
   0xd   :  { %38 = dma.hbm_to_vmem [thread:$0]  %s1220_s1, 128, %s36_s14, [#allocation5]  }
   0xe   :  { %s1099_s18 = smov [#allocation7]   ;;  %s1100_s20 = smov [#allocation2]  }
   0xf   :  { %s56_s19 = sshll.u32 %s1099_s18, 4  ;;  %s25_s21 = sshll.u32 %s1100_s20, 4  ;;  %s57_s19 = int_to_ptr.vmem [resolvable:$true] %s56_s19  ;;  %s26_s21 = int_to_ptr.vmem [resolvable:$true] %s25_s21 }
  0x10   :  { %s998_s22 = scalar_lea.vmem %s57_s19, 256  ;;  %p1003_p6 = scmp.lt.s32.totalorder %s57_s19, %s57_s19 }
  0x11   :  { %p999_p5 = scmp.ne.s32.totalorder %s57_s19, %s998_s22  ;;  %p1004_p7 = scmp.lt.s32.totalorder %s998_s22, %s998_s22 }
  0x13   :  { %p1005_p8 = por %p1004_p7, %p1003_p6 }
  0x15   :  { %p1006_p9 = pnand %p1005_p8, %p999_p5 }
  0x17   :  { %1009 = shalt.err (!%p1006_p9)
}
  0x18   :  { %s1101_s23 = smov 128   ;;  %s1102_s24 = smov 8  }
  0x19   :  { %62 = dma.hbm_to_vmem [thread:$0]  %s1222_s3, 256, %s57_s19, [#allocation8], %s1101_s23, %s1101_s23, %s1102_s24  }
  0x1a   :  { %s1018_s1 = scalar_lea.vmem %s26_s21, 128  ;;  %p1023_p11 = scmp.lt.s32.totalorder %s26_s21, %s26_s21 }
  0x1b   :  { %p1019_p10 = scmp.ne.s32.totalorder %s26_s21, %s1018_s1  ;;  %p1024_p12 = scmp.lt.s32.totalorder %s1018_s1, %s1018_s1 }
  0x1d   :  { %p1025_p13 = por %p1024_p12, %p1023_p11 }
  0x1f   :  { %p1026_p0 = pnand %p1025_p13, %p1019_p10 }
  0x21   :  { %1029 = shalt.err (!%p1026_p0)
}
  0x22   :  { %28 = dma.hbm_to_vmem [thread:$0]  %s1219_s0, 128, %s26_s21, [#allocation3]  }
  0x23   :  { %s1103_s29 = smov [#allocation6]   ;;  %s1104_s11 = smov [#allocation9]  }
  0x24   :  { %s44_s30 = sshll.u32 %s1103_s29, 4  ;;  %s70_s12 = sshll.u32 %s1104_s11, 4  ;;  %s45_s30 = int_to_ptr.vmem [resolvable:$true] %s44_s30  ;;  %s71_s12 = int_to_ptr.vmem [resolvable:$true] %s70_s12 }
  0x25   :  { %s1038_s13 = scalar_lea.vmem %s45_s30, 256  ;;  %p1043_p2 = scmp.lt.s32.totalorder %s45_s30, %s45_s30 }
  0x26   :  { %p1039_p1 = scmp.ne.s32.totalorder %s45_s30, %s1038_s13  ;;  %p1044_p3 = scmp.lt.s32.totalorder %s1038_s13, %s1038_s13 }
  0x28   :  { %p1045_p4 = por %p1044_p3, %p1043_p2 }
  0x2a   :  { %p1046_p5 = pnand %p1045_p4, %p1039_p1 }
  0x2c   :  { %1049 = shalt.err (!%p1046_p5)
}
  0x2d   :  { %50 = dma.hbm_to_vmem [thread:$0]  %s1221_s2, 256, %s45_s30, [#allocation5], %s1101_s23, %s1101_s23, %s1102_s24  }
  0x2e   :  { %s1058_s0 = scalar_lea.vmem %s71_s12, 4096  ;;  %p1063_p7 = scmp.lt.s32.totalorder %s71_s12, %s71_s12 }
  0x2f   :  { %p1059_p6 = scmp.ne.s32.totalorder %s71_s12, %s1058_s0  ;;  %p1064_p8 = scmp.lt.s32.totalorder %s1058_s0, %s1058_s0 }
  0x31   :  { %p1065_p9 = por %p1064_p8, %p1063_p7 }
  0x33   :  { %p1066_p10 = pnand %p1065_p9, %p1059_p6 }
  0x35   :  { %1069 = shalt.err (!%p1066_p10)
}
  0x36   :  { %76 = dma.hbm_to_vmem [thread:$0]  %s1224_s5, 4096, %s71_s12, [#allocation8], %s1101_s23, %s1101_s23, %s1102_s24  }
  0x37   :  { %s1105_s17 = smov [#allocation10]  }
  0x38   :  { %s84_s18 = sshll.u32 %s1105_s17, 4  ;;  %s85_s18 = int_to_ptr.vmem [resolvable:$true] %s84_s18 }
  0x39   :  { %s1078_s19 = scalar_lea.vmem %s85_s18, 4096  ;;  %p1083_p12 = scmp.lt.s32.totalorder %s85_s18, %s85_s18 }
  0x3a   :  { %p1079_p11 = scmp.ne.s32.totalorder %s85_s18, %s1078_s19  ;;  %p1084_p13 = scmp.lt.s32.totalorder %s1078_s19, %s1078_s19 }
  0x3c   :  { %p1085_p0 = por %p1084_p13, %p1083_p12 }
  0x3e   :  { %p1086_p1 = pnand %p1085_p0, %p1079_p11 }
  0x40   :  { %1089 = shalt.err (!%p1086_p1)
}
  0x41   :  { %90 = dma.hbm_to_vmem [thread:$0]  %s1226_s7, 4096, %s85_s18, [#allocation11], %s1101_s23, %s1101_s23, %s1102_s24  }
  0x42   :  { %1090 = dma.done.wait [#allocation3], 128  }
  0x43   :  { %1091 = vsyncadd [#allocation3], 4294967168 }
  0x44   :  { %1092 = dma.done.wait [#allocation5], 384  }
  0x45   :  { %1093 = vsyncadd [#allocation5], 4294966912 }
  0x46   :  { %1094 = dma.done.wait [#allocation8], 4352  }
  0x47   :  { %1095 = vsyncadd [#allocation8], 4294962944 }
  0x48   :  { %1096 = dma.done.wait [#allocation11], 4096  }
  0x49   :  { %1097 = vsyncadd [#allocation11], 4294963200  ;;  %v1106_v0 = vmov 0   ;;  %v864_v1 = vld [vmem:[#allocation7 + $0x4] ss:$8 sps:$4 sm:$0xff]   ;;  %vm132_vm0 = vcmask 130048  }
  0x4a   :  { %168 = vmatprep.mubr.bf16.mxu0 %v1106_v0  ;;  %222 = vmatprep.mubr.bf16.mxu1 %v1106_v0  ;;  %v866_v2 = vld [vmem:[#allocation6 + $0x4] ss:$8 sps:$4 sm:$0xff]   ;;  %v868_v3 = vld [vmem:[#allocation7] ss:$8 sps:$4 sm:$0xff]   ;;  %v869_v4 = vld [vmem:[#allocation6] ss:$8 sps:$4 sm:$0xff]  }
  0x4b   :  { %150 = vmatprep.subr.bf16.mxu0 %v864_v1  ;;  %v118_v5 = vld [vmem:[#allocation4] sm:$0xff]  ;;  %204 = vmatprep.subr.bf16.mxu1 %v866_v2  ;;  %v114_v7 = vld [vmem:[#allocation2] sm:$0xff]  ;;  %v875_v11 = vld [vmem:[#allocation9 + $0x64] ss:$8 sps:$4 sm:$0xff]   ;;  %vm774_vm1 = vcmask 7168  }
  0x4c   :  { %v119_v6 = vpack.c.bf16 %v118_v5, %v118_v5  ;;  %151 = vmatpush1.bf16.msra.mxu0 %v868_v3  ;;  %205 = vmatpush1.bf16.msra.mxu1 %v869_v4  ;;  %v115_v8 = vpack.c.bf16 %v114_v7, %v114_v7  ;;  %v870_v9 = vld [vmem:[#allocation9 + $0x70] ss:$8 sps:$4 sm:$0xff]   ;;  %v872_v10 = vld [vmem:[#allocation9 + $0x74] ss:$8 sps:$4 sm:$0xff]   ;;  %v873_v12 = vld [vmem:[#allocation9 + $0x60] ss:$8 sps:$4 sm:$0xff]   ;;  %v233_v3 = vlaneseq }
  0x4d   :  { %455 = vmatprep.subr.bf16.mxu0 %v872_v10  ;;  %v878_v13 = vld [vmem:[#allocation9 + $0x54] ss:$8 sps:$4 sm:$0xff]   ;;  %v876_v14 = vld [vmem:[#allocation9 + $0x50] ss:$8 sps:$4 sm:$0xff]   ;;  %v881_v15 = vld [vmem:[#allocation9 + $0x44] ss:$8 sps:$4 sm:$0xff]  }
  0x4e   :  { %v879_v16 = vld [vmem:[#allocation9 + $0x40] ss:$8 sps:$4 sm:$0xff]   ;;  %v884_v17 = vld [vmem:[#allocation9 + $0x34] ss:$8 sps:$4 sm:$0xff]   ;;  %v882_v18 = vld [vmem:[#allocation9 + $0x30] ss:$8 sps:$4 sm:$0xff]  }
  0x4f   :  { %786 = vmatmul.mubr.msk.bf16.vlgmr.msra.gmra.mxu0 %vm132_vm0, %v119_v6  ;;  %789 = vmatmul.mubr.msk.bf16.vlgmr.msra.gmra.mxu1 %vm132_vm0, %v115_v8  ;;  %v887_v19 = vld [vmem:[#allocation9 + $0x24] ss:$8 sps:$4 sm:$0xff]   ;;  %v885_v20 = vld [vmem:[#allocation9 + $0x20] ss:$8 sps:$4 sm:$0xff]   ;;  %v890_v21 = vld [vmem:[#allocation9 + $0x14] ss:$8 sps:$4 sm:$0xff]  }
  0x50   :  { %456 = vmatpush1.bf16.msra.mxu0 %v870_v9  ;;  %v888_v22 = vld [vmem:[#allocation9 + $0x10] ss:$8 sps:$4 sm:$0xff]   ;;  %v893_v23 = vld [vmem:[#allocation9 + $0x4] ss:$8 sps:$4 sm:$0xff]   ;;  %v891_v24 = vld [vmem:[#allocation9] ss:$8 sps:$4 sm:$0xff]  }
  0x51   :  { %457 = vmatprep.subr.bf16.mxu0 %v875_v11  ;;  %v896_v25 = vld [vmem:[#allocation9 + $0xf4] ss:$8 sps:$4 sm:$0xff]   ;;  %v894_v26 = vld [vmem:[#allocation9 + $0xf0] ss:$8 sps:$4 sm:$0xff]   ;;  %v899_v27 = vld [vmem:[#allocation9 + $0xe4] ss:$8 sps:$4 sm:$0xff]  }
  0x52   :  { %v897_v28 = vld [vmem:[#allocation9 + $0xe0] ss:$8 sps:$4 sm:$0xff]   ;;  %v902_v29 = vld [vmem:[#allocation9 + $0xd4] ss:$8 sps:$4 sm:$0xff]   ;;  %v900_v30 = vld [vmem:[#allocation9 + $0xd0] ss:$8 sps:$4 sm:$0xff]  }
  0x53   :  { %v905_v31 = vld [vmem:[#allocation9 + $0xc4] ss:$8 sps:$4 sm:$0xff]   ;;  %v903_v32 = vld [vmem:[#allocation9 + $0xc0] ss:$8 sps:$4 sm:$0xff]   ;;  %v908_v33 = vld [vmem:[#allocation9 + $0xb4] ss:$8 sps:$4 sm:$0xff]  }
  0x54   :  { %458 = vmatpush1.bf16.msra.mxu0 %v873_v12  ;;  %v906_v34 = vld [vmem:[#allocation9 + $0xb0] ss:$8 sps:$4 sm:$0xff]   ;;  %v911_v35 = vld [vmem:[#allocation9 + $0xa4] ss:$8 sps:$4 sm:$0xff]   ;;  %v909_v36 = vld [vmem:[#allocation9 + $0xa0] ss:$8 sps:$4 sm:$0xff]  }
  0x55   :  { %459 = vmatprep.subr.bf16.mxu0 %v878_v13  ;;  %v914_v37 = vld [vmem:[#allocation9 + $0x94] ss:$8 sps:$4 sm:$0xff]   ;;  %v912_v38 = vld [vmem:[#allocation9 + $0x90] ss:$8 sps:$4 sm:$0xff]   ;;  %v917_v39 = vld [vmem:[#allocation9 + $0x84] ss:$8 sps:$4 sm:$0xff]  }
  0x56   :  { %v915_v40 = vld [vmem:[#allocation9 + $0x80] ss:$8 sps:$4 sm:$0xff]   ;;  %v918_v41 = vld [vmem:[#allocation10 + $0x70] ss:$8 sps:$4 sm:$0xff]   ;;  %v920_v42 = vld [vmem:[#allocation10 + $0x74] ss:$8 sps:$4 sm:$0xff]  }
  0x57   :  { %v923_v43 = vld [vmem:[#allocation10 + $0x64] ss:$8 sps:$4 sm:$0xff]   ;;  %706 = vmatprep.subr.bf16.mxu1 %v920_v42  ;;  %v921_v44 = vld [vmem:[#allocation10 + $0x60] ss:$8 sps:$4 sm:$0xff]   ;;  %v926_v45 = vld [vmem:[#allocation10 + $0x54] ss:$8 sps:$4 sm:$0xff]  }
  0x58   :  { %460 = vmatpush1.bf16.msra.mxu0 %v876_v14  ;;  %707 = vmatpush1.bf16.msra.mxu1 %v918_v41  ;;  %v924_v46 = vld [vmem:[#allocation10 + $0x50] ss:$8 sps:$4 sm:$0xff]   ;;  %v929_v47 = vld [vmem:[#allocation10 + $0x44] ss:$8 sps:$4 sm:$0xff]   ;;  %v927_v48 = vld [vmem:[#allocation10 + $0x40] ss:$8 sps:$4 sm:$0xff]  }
  0x59   :  { %461 = vmatprep.subr.bf16.mxu0 %v881_v15  ;;  %708 = vmatprep.subr.bf16.mxu1 %v923_v43  ;;  %v932_v49 = vld [vmem:[#allocation10 + $0x34] ss:$8 sps:$4 sm:$0xff]   ;;  %v930_v50 = vld [vmem:[#allocation10 + $0x30] ss:$8 sps:$4 sm:$0xff]   ;;  %v935_v51 = vld [vmem:[#allocation10 + $0x24] ss:$8 sps:$4 sm:$0xff]  }
  0x5a   :  { %v933_v52 = vld [vmem:[#allocation10 + $0x20] ss:$8 sps:$4 sm:$0xff]   ;;  %v938_v53 = vld [vmem:[#allocation10 + $0x14] ss:$8 sps:$4 sm:$0xff]   ;;  %v936_v54 = vld [vmem:[#allocation10 + $0x10] ss:$8 sps:$4 sm:$0xff]  }
  0x5b   :  { %v941_v55 = vld [vmem:[#allocation10 + $0x4] ss:$8 sps:$4 sm:$0xff]   ;;  %v939_v56 = vld [vmem:[#allocation10] ss:$8 sps:$4 sm:$0xff]   ;;  %v944_v57 = vld [vmem:[#allocation10 + $0xf4] ss:$8 sps:$4 sm:$0xff]  }
  0x5c   :  { %462 = vmatpush1.bf16.msra.mxu0 %v879_v16  ;;  %709 = vmatpush1.bf16.msra.mxu1 %v921_v44  ;;  %v942_v58 = vld [vmem:[#allocation10 + $0xf0] ss:$8 sps:$4 sm:$0xff]   ;;  %v947_v59 = vld [vmem:[#allocation10 + $0xe4] ss:$8 sps:$4 sm:$0xff]   ;;  %v945_v60 = vld [vmem:[#allocation10 + $0xe0] ss:$8 sps:$4 sm:$0xff]  }
  0x5d   :  { %463 = vmatprep.subr.bf16.mxu0 %v884_v17  ;;  %710 = vmatprep.subr.bf16.mxu1 %v926_v45  ;;  %v950_v61 = vld [vmem:[#allocation10 + $0xd4] ss:$8 sps:$4 sm:$0xff]   ;;  %v948_v62 = vld [vmem:[#allocation10 + $0xd0] ss:$8 sps:$4 sm:$0xff]   ;;  %v953_v63 = vld [vmem:[#allocation10 + $0xc4] ss:$8 sps:$4 sm:$0xff]  }
  0x5e   :  { %v951_v0 = vld [vmem:[#allocation10 + $0xc0] ss:$8 sps:$4 sm:$0xff]   ;;  %v956_v1 = vld [vmem:[#allocation10 + $0xb4] ss:$8 sps:$4 sm:$0xff]   ;;  %v954_v2 = vld [vmem:[#allocation10 + $0xb0] ss:$8 sps:$4 sm:$0xff]  }
  0x5f   :  { %v234_v4 = vshrl.u32 %v233_v3, 7  ;;  %v231_v6 = vld [vmem:[%s1223_s4] sm:$0x3] }
  0x60   :  { %464 = vmatpush1.bf16.msra.mxu0 %v882_v18  ;;  %711 = vmatpush1.bf16.msra.mxu1 %v924_v46 }
  0x61   :  { %465 = vmatprep.subr.bf16.mxu0 %v887_v19  ;;  %712 = vmatprep.subr.bf16.mxu1 %v929_v47  ;;  %v1192_v5 = vsub.s32 0, %v234_v4  ;;  %v1197_v7 = vsub.s32 1, %v234_v4 }
  0x63   :  { %v236_v8 = vrot.slane %v231_v6, %v1192_v5  ;;  %v240_v12 = vrot.slane %v231_v6, %v1197_v7 }
  0x64   :  { %466 = vmatpush1.bf16.msra.mxu0 %v885_v20  ;;  %713 = vmatpush1.bf16.msra.mxu1 %v927_v48 }
  0x65   :  { %467 = vmatprep.subr.bf16.mxu0 %v890_v21  ;;  %714 = vmatprep.subr.bf16.mxu1 %v932_v49  ;;  %v534_v49 = vld [vmem:[%s1227_s8] sm:$0x3] }
  0x68   :  { %468 = vmatpush1.bf16.msra.mxu0 %v888_v22  ;;  %715 = vmatpush1.bf16.msra.mxu1 %v930_v50  ;;  %v539_v50 = vrot.slane %v534_v49, %v1192_v5 }
  0x69   :  { %469 = vmatprep.subr.bf16.mxu0 %v893_v23  ;;  %716 = vmatprep.subr.bf16.mxu1 %v935_v51  ;;  %v543_v51 = vrot.slane %v534_v49, %v1197_v7 }
  0x6c   :  { %470 = vmatpush1.bf16.msra.mxu0 %v891_v24  ;;  %717 = vmatpush1.bf16.msra.mxu1 %v933_v52 }
  0x6d   :  { %471 = vmatprep.subr.bf16.mxu0 %v896_v25  ;;  %718 = vmatprep.subr.bf16.mxu1 %v938_v53 }
  0x70   :  { %472 = vmatpush2.bf16.msra.mxu0 %v894_v26  ;;  %719 = vmatpush1.bf16.msra.mxu1 %v936_v54 }
  0x71   :  { %473 = vmatprep.subr.bf16.mxu0 %v899_v27  ;;  %720 = vmatprep.subr.bf16.mxu1 %v941_v55  ;;  %v751_v55 = vld [vmem:[%s1228_s9] sm:$0x3] }
  0x74   :  { %474 = vmatpush2.bf16.msra.mxu0 %v897_v28  ;;  %721 = vmatpush1.bf16.msra.mxu1 %v939_v56  ;;  %v959_v28 = vld [vmem:[#allocation10 + $0xa4] ss:$8 sps:$4 sm:$0xff]  }
  0x75   :  { %475 = vmatprep.subr.bf16.mxu0 %v902_v29  ;;  %722 = vmatprep.subr.bf16.mxu1 %v944_v57  ;;  %v957_v29 = vld [vmem:[#allocation10 + $0xa0] ss:$8 sps:$4 sm:$0xff]  }
  0x78   :  { %476 = vmatpush2.bf16.msra.mxu0 %v900_v30  ;;  %723 = vmatpush2.bf16.msra.mxu1 %v942_v58  ;;  %v962_v30 = vld [vmem:[#allocation10 + $0x94] ss:$8 sps:$4 sm:$0xff]  }
  0x79   :  { %477 = vmatprep.subr.bf16.mxu0 %v905_v31  ;;  %724 = vmatprep.subr.bf16.mxu1 %v947_v59  ;;  %v960_v31 = vld [vmem:[#allocation10 + $0x90] ss:$8 sps:$4 sm:$0xff]  }
  0x7c   :  { %478 = vmatpush2.bf16.msra.mxu0 %v903_v32  ;;  %725 = vmatpush2.bf16.msra.mxu1 %v945_v60  ;;  %v965_v32 = vld [vmem:[#allocation10 + $0x84] ss:$8 sps:$4 sm:$0xff]  }
  0x7d   :  { %479 = vmatprep.subr.bf16.mxu0 %v908_v33  ;;  %726 = vmatprep.subr.bf16.mxu1 %v950_v61  ;;  %v963_v33 = vld [vmem:[#allocation10 + $0x80] ss:$8 sps:$4 sm:$0xff]   ;;  %v756_v61 = vrot.slane %v751_v55, %v1192_v5 }
  0x80   :  { %480 = vmatpush2.bf16.msra.mxu0 %v906_v34  ;;  %727 = vmatpush2.bf16.msra.mxu1 %v948_v62  ;;  %v283_v34 = vld [vmem:[%s1225_s6] sm:$0x3]  ;;  %v760_v62 = vrot.slane %v751_v55, %v1197_v7 }
  0x81   :  { %481 = vmatprep.subr.bf16.mxu0 %v911_v35  ;;  %728 = vmatprep.subr.bf16.mxu1 %v953_v63  ;;  %v288_v35 = vrot.slane %v283_v34, %v1192_v5 }
  0x84   :  { %482 = vmatpush2.bf16.msra.mxu0 %v909_v36  ;;  %729 = vmatpush2.bf16.msra.mxu1 %v951_v0  ;;  %v292_v36 = vrot.slane %v283_v34, %v1197_v7 }
  0x85   :  { %483 = vmatprep.subr.bf16.mxu0 %v914_v37  ;;  %730 = vmatprep.subr.bf16.mxu1 %v956_v1 }
  0x88   :  { %484 = vmatpush2.bf16.msra.mxu0 %v912_v38  ;;  %731 = vmatpush2.bf16.msra.mxu1 %v954_v2 }
  0x89   :  { %485 = vmatprep.subr.bf16.mxu0 %v917_v39  ;;  %732 = vmatprep.subr.bf16.mxu1 %v959_v28 }
  0x8c   :  { %486 = vmatpush2.bf16.msra.mxu0 %v915_v40  ;;  %733 = vmatpush2.bf16.msra.mxu1 %v957_v29 }
  0x8d   :  { %734 = vmatprep.subr.bf16.mxu1 %v962_v30 }
  0x90   :  { %735 = vmatpush2.bf16.msra.mxu1 %v960_v31 }
  0x91   :  { %736 = vmatprep.subr.bf16.mxu1 %v965_v32 }
  0x94   :  { %737 = vmatpush2.bf16.msra.mxu1 %v963_v33 }
 0x10f   :  { %v170_v9 = vpop.f32.mrf.mxu0  ;;  %v224_v10 = vpop.f32.mrf.mxu1 }
 0x110   :  { %v225_v11 = vadd.f32 %v224_v10, %v170_v9 }
 0x111   :  { %v172_v13 = vpop.f32.mrf.mxu0  ;;  %v226_v14 = vpop.f32.mrf.mxu1 }
 0x112   :  { %v243_v15 = vadd.f32 %v236_v8, %v225_v11  ;;  %v227_v16 = vadd.f32 %v226_v14, %v172_v13 }
 0x113   :  { %v174_v17 = vpop.f32.mrf.mxu0  ;;  %v228_v18 = vpop.f32.mrf.mxu1 }
 0x114   :  { %v245_v19 = vmul.f32 0.2, %v243_v15  ;;  %v244_v20 = vadd.f32 %v240_v12, %v227_v16 }
 0x115   :  { %v175_v21 = vpop.f32.mrf.mxu0  ;;  %v229_v22 = vpop.f32.mrf.mxu1 }
 0x116   :  { %v246_v23 = vmul.f32 0.2, %v244_v20  ;;  %v247_v24 = vmax.f32 %v243_v15, %v245_v19 }
 0x118   :  { %v248_v25 = vmax.f32 %v244_v20, %v246_v23  ;;  %v249_v27 = vpack.c.bf16 %v247_v24, %v247_v24 }
 0x11a   :  { %v250_v26 = vpack.c.bf16 %v248_v25, %v248_v25 }
 0x11c   :  { %487 = vmatprep.mubr.bf16.mxu0 %v250_v26 }
 0x11d   :  { %488 = vmatmul.mubr.bf16.vlgmr.msra.gmra.mxu0 %v249_v27 }
 0x1dd   :  { %v489_v37 = vpop.f32.mrf.mxu0 }
 0x1de   :  { %v490_v38 = vadd.f32 %v489_v37, %v288_v35 }
 0x1df   :  { %v491_v39 = vpop.f32.mrf.mxu0 }
 0x1e0   :  { %v496_v40 = vmul.f32 0.2, %v490_v38  ;;  %v492_v41 = vadd.f32 %v491_v39, %v292_v36 }
 0x1e1   :  { %v493_v42 = vpop.f32.mrf.mxu0 }
 0x1e2   :  { %v497_v43 = vmul.f32 0.2, %v492_v41  ;;  %v498_v44 = vmax.f32 %v490_v38, %v496_v40 }
 0x1e3   :  { %v494_v45 = vpop.f32.mrf.mxu0 }
 0x1e4   :  { %v499_v46 = vmax.f32 %v492_v41, %v497_v43  ;;  %v500_v48 = vpack.c.bf16 %v498_v44, %v498_v44 }
 0x1e6   :  { %v501_v47 = vpack.c.bf16 %v499_v46, %v499_v46 }
 0x1e8   :  { %738 = vmatprep.mubr.bf16.mxu1 %v501_v47 }
 0x1e9   :  { %739 = vmatmul.mubr.bf16.vlgmr.msra.gmra.mxu1 %v500_v48 }
 0x2a9   :  { %v740_v52 = vpop.f32.mrf.mxu1 }
 0x2aa   :  { %v741_v53 = vadd.f32 %v740_v52, %v539_v50 }
 0x2ab   :  { %v742_v54 = vpop.f32.mrf.mxu1 }
 0x2ac   :  { %v747_v56 = vmul.f32 0.2, %v741_v53  ;;  %v743_v57 = vadd.f32 %v742_v54, %v543_v51 }
 0x2ad   :  { %v744_v58 = vpop.f32.mrf.mxu1 }
 0x2ae   :  { %v749_v59 = vmax.f32 %v741_v53, %v747_v56  ;;  %v748_v60 = vmul.f32 0.2, %v743_v57 }
 0x2af   :  { %v745_v63 = vpop.f32.mrf.mxu1 }
 0x2b0   :  { %v750_v0 = vmax.f32 %v743_v57, %v748_v60  ;;  %v763_v1 = vmul.f32 %v756_v61, %v749_v59 }
 0x2b2   :  { %v764_v2 = vmul.f32 %v760_v62, %v750_v0 }
 0x2b4   :  { %v765_v3 = vadd.f32 %v764_v2, %v763_v1 }
 0x2b6   :  { %766 = vadd.xlane.f32.xlu0 %v765_v3 }
 0x33f   :  { %v767_v4 = vpop.xlane.xlu0 %766 }
 0x340   :  { %v854_v6 = vmul.f32 -1.442695, %v767_v4 }
 0x342   :  { %966 = vpow2.f32 %v854_v6 }
 0x34f   :  { %v967_v8 = vpop.eup %966 }
 0x350   :  { %v771_v9 = vadd.f32 1.0, %v967_v8 }
 0x352   :  { %968 = vrcp.f32 %v771_v9 }
 0x35f   :  { %v969_v10 = vpop.eup %968 }
 0x360   :  { %775 = vst.msk [vmem:[%s1229_s10] sm:$0xff] %vm774_vm1, %v969_v10 }
 0x361   :  { %780 = vsyncpa [#allocation3], 1 }
 0x362   :  { %781 = vsyncpa [#allocation5], 1 }
 0x363   :  { %782 = vsyncpa [#allocation8], 1 }
 0x364   :  { %783 = vsyncpa [#allocation11], 1 }

</bundles_post_ra>
